<compile_context>
chip_gen: v6e
topology: v6e:2x2x1
jax: 0.10.0
libtpu: 0.0.40
codegen_flags: <defaults>
</compile_context>

<pallas_src>
import functools
import math

import jax
import jax.numpy as jnp
from jax import lax
from jax.experimental import pallas as pl
from jax.experimental.pallas import tpu as pltpu


# ---------------------------------------------------------------------------
# Counter-based in-kernel RNG (portable: plain int32 ops, no TPU-only prims).
# ---------------------------------------------------------------------------
def _to_i32(v: int) -> int:
    v &= 0xFFFFFFFF
    return v - (1 << 32) if v >= (1 << 31) else v


_MIX1 = _to_i32(0x85EBCA6B)
_MIX2 = _to_i32(0xC2B2AE35)
_GOLD = _to_i32(0x9E3779B9)


def _srl(x, n):
    # logical right shift on int32 lanes (bit pattern identical to uint32 math)
    return lax.shift_right_logical(x, jnp.full(x.shape, n, dtype=x.dtype))


def _fmix32(h):
    # murmur3 finalizer: good avalanche, 5 cheap VPU ops per element.
    h = h ^ _srl(h, 16)
    h = h * jnp.int32(_MIX1)
    h = h ^ _srl(h, 13)
    h = h * jnp.int32(_MIX2)
    h = h ^ _srl(h, 16)
    return h


# ---------------------------------------------------------------------------
# Kernel: out = dropout(x + pe, p)   (inverted dropout, integer threshold)
# ---------------------------------------------------------------------------
def _pe_dropout_kernel(seed_ref, x_ref, pe_ref, o_ref, *, p: float, block_rows: int):
    x = x_ref[...]                      # (TS, B, D)
    y = x + pe_ref[...]                 # (TS, 1, D) broadcasts over batch

    if p > 0.0:
        ts, b_dim, d_dim = x_ref.shape
        pid = pl.program_id(0)

        # Global element id for every element of this tile.
        r = lax.broadcasted_iota(jnp.int32, (ts, b_dim, d_dim), 0)
        b = lax.broadcasted_iota(jnp.int32, (ts, b_dim, d_dim), 1)
        d = lax.broadcasted_iota(jnp.int32, (ts, b_dim, d_dim), 2)
        row = pid * block_rows + r
        gid = (row * b_dim + b) * d_dim + d

        bits = _fmix32(gid ^ (seed_ref[0] * jnp.int32(_GOLD)))

        # keep with prob (1 - p): signed-domain threshold on a uniform 32-bit hash.
        t = int(round(p * 2.0 ** 32)) - (1 << 31)
        t = min(max(t, -(1 << 31)), (1 << 31) - 1)
        keep = bits >= jnp.int32(t)

        scale = jnp.asarray(1.0 / (1.0 - p), dtype=y.dtype)
        y = jnp.where(keep, y * scale, jnp.zeros((), dtype=y.dtype))

    o_ref[...] = y.astype(o_ref.dtype)


# ---------------------------------------------------------------------------
# Buffer setup (plain JAX glue) -- mirrors the PyTorch __init__.
# ---------------------------------------------------------------------------
def make_positional_encoding(d_model: int, max_len: int = 5000) -> jnp.ndarray:
    position = jnp.arange(max_len, dtype=jnp.float32)[:, None]                 # (max_len, 1)
    div_term = jnp.exp(
        jnp.arange(0, d_model, 2, dtype=jnp.float32) * (-math.log(10000.0) / d_model)
    )
    pe = jnp.zeros((max_len, 1, d_model), dtype=jnp.float32)
    pe = pe.at[:, 0, 0::2].set(jnp.sin(position * div_term))
    pe = pe.at[:, 0, 1::2].set(jnp.cos(position * div_term))
    return pe


def _choose_block_rows(S: int, B: int, D: int, itemsize: int,
                       target_bytes: int = 2 * 1024 * 1024) -> int:
    """Pick seq-tile so an x block is ~2 MiB: with 2x double-buffered inputs and
    2x output buffers the footprint stays under the smallest (v5e 16 MiB)
    default scoped-VMEM limit on every TPU generation."""
    row_bytes = max(1, B * D * itemsize)
    rows = max(1, target_bytes // row_bytes)
    rows = min(int(rows), S)
    if rows >= 8:
        rows = (rows // 8) * 8
    return rows


# ---------------------------------------------------------------------------
# Wrapper
# ---------------------------------------------------------------------------
def positional_encoding_forward(x, pe, *, dropout_p=0.1, train=True, seed=0,
                                block_rows=None):
    """x: (S, B, D);  pe: (max_len, 1, D) float32."""
    S, B, D = x.shape
    pe_slice = pe[:S].astype(x.dtype)                    # (S, 1, D), compute in x.dtype
    p = float(dropout_p) if train else 0.0
    seed_arr = jnp.asarray([seed], dtype=jnp.int32)

    itemsize = jnp.dtype(x.dtype).itemsize
    ts = _choose_block_rows(S, B, D, itemsize) if block_rows is None else min(int(block_rows), S)
    grid = (pl.cdiv(S, ts),)

    # NOTE: block last-two dims (B, D) equal the full array dims, so the (8,128)
    # constraint is satisfied for any B, D.  For realistic transformer shapes
    # (B >= 8, D >= 128) the (B, D) vreg tile is fully dense.
    kernel = functools.partial(_pe_dropout_kernel, p=p, block_rows=ts)
    return pl.pallas_call(
        kernel,
        out_shape=jax.ShapeDtypeStruct((S, B, D), x.dtype),
        grid=grid,
        in_specs=[
            pl.BlockSpec(memory_space=pltpu.MemorySpace.SMEM),   # seed scalar
            pl.BlockSpec((ts, B, D), lambda i: (i, 0, 0)),       # x: tiled over S
            pl.BlockSpec((ts, 1, D), lambda i: (i, 0, 0)),       # pe: tiled over S
        ],
        out_specs=pl.BlockSpec((ts, B, D), lambda i: (i, 0, 0)),
        compiler_params=pltpu.CompilerParams(
            dimension_semantics=("parallel",),                   # megacore on v7x
            vmem_limit_bytes=32 * 1024 * 1024,
        ),
    )(seed_arr, x, pe_slice)


if __name__ == "__main__":
    # Small shapes consistent with the module (seq-first transformer input).
    S, B, D = 8, 2, 32
    key = jax.random.PRNGKey(0)
    x = jax.random.normal(key, (S, B, D), dtype=jnp.float32)
    pe = make_positional_encoding(d_model=D, max_len=5000)
    ref = x + pe[:S]

    # Eval mode (dropout is identity): bit-exact vs pure-JAX reference.
    out_eval = jax.block_until_ready(
        positional_encoding_forward(x, pe, dropout_p=0.1, train=False))
    assert out_eval.shape == (S, B, D)
    assert jnp.allclose(out_eval, ref, atol=1e-6), "eval-mode mismatch"

    # Train mode: in-kernel inverted dropout.
    # TODO(synk): torch's exact dropout RNG stream cannot be reproduced; the
    # kernel uses a deterministic counter-based hash with matching keep-prob /
    # 1/(1-p) scaling semantics.
    p = 0.1
    out_tr = jax.block_until_ready(
        positional_encoding_forward(x, pe, dropout_p=p, train=True, seed=42))
    scaled = ref / (1.0 - p)
    ok = jnp.all(jnp.isclose(out_tr, scaled, atol=1e-5) | (out_tr == 0.0))
    assert bool(ok), "train-mode dropout semantics mismatch"
    drop_frac = float(jnp.mean((out_tr == 0.0).astype(jnp.float32)))
    assert 0.0 < drop_frac < 0.5, f"implausible drop fraction {drop_frac}"

    # Multi-tile grid (grid > 1): exercises tiled BlockSpecs and verifies the
    # dropout mask varies across S-tiles (per-element counter RNG).
    S2 = 32
    x2 = jax.random.normal(jax.random.PRNGKey(1), (S2, B, D), dtype=jnp.float32)
    out2_eval = jax.block_until_ready(
        positional_encoding_forward(x2, pe, dropout_p=p, train=False, block_rows=8))
    assert jnp.allclose(out2_eval, x2 + pe[:S2], atol=1e-6), "tiled eval mismatch"
    out2_tr = jax.block_until_ready(
        positional_encoding_forward(x2, pe, dropout_p=p, train=True, seed=7, block_rows=8))
    m = (out2_tr == 0.0)
    assert bool(jnp.any(m[0:8] != m[8:16])), "dropout mask repeats across tiles"

    print("KERNEL_OK")
</pallas_src>

<mosaic_0001>
module attributes {stable_mosaic.version = 11 : i64} {
  func.func @_pe_dropout_kernel(%arg0: i32, %arg1: memref<1xi32, #tpu.memory_space<smem>>, %arg2: memref<8x2x32xf32, #tpu.memory_space<vmem>>, %arg3: memref<8x1x32xf32, #tpu.memory_space<vmem>>, %arg4: memref<8x2x32xf32, #tpu.memory_space<vmem>>) attributes {dimension_semantics = [#tpu.dimension_semantics<parallel>], iteration_bounds = array<i64: 1>, scalar_prefetch = 0 : i64, scratch_operands = 0 : i64, tpu.core_type = #tpu.core_type<tc>, window_params = [{transform_indices = @transform_0, window_bounds = array<i64: 1>}, {transform_indices = @transform_1, window_bounds = array<i64: 8, 2, 32>}, {transform_indices = @transform_2, window_bounds = array<i64: 8, 1, 32>}, {transform_indices = @transform_3, window_bounds = array<i64: 8, 2, 32>}]} {
    %c0 = arith.constant 0 : index
    %c0_0 = arith.constant 0 : index
    %c0_1 = arith.constant 0 : index
    %0 = vector.load %arg2[%c0, %c0_0, %c0_1] : memref<8x2x32xf32, #tpu.memory_space<vmem>>, vector<8x2x32xf32>
    %c0_2 = arith.constant 0 : index
    %c0_3 = arith.constant 0 : index
    %c0_4 = arith.constant 0 : index
    %1 = vector.load %arg3[%c0_2, %c0_3, %c0_4] : memref<8x1x32xf32, #tpu.memory_space<vmem>>, vector<8x1x32xf32>
    %2 = vector.broadcast %1 : vector<8x1x32xf32> to vector<8x2x32xf32>
    %3 = arith.addf %0, %2 : vector<8x2x32xf32>
    %c0_5 = arith.constant 0 : index
    %c0_6 = arith.constant 0 : index
    %c0_7 = arith.constant 0 : index
    %4 = vector.load %arg4[%c0_5, %c0_6, %c0_7] : memref<8x2x32xf32, #tpu.memory_space<vmem>>, vector<8x2x32xf32>
    tpu.vector_store %arg4[%c0_5, %c0_6, %c0_7], %3 {strides = array<i32>} : memref<8x2x32xf32, #tpu.memory_space<vmem>>, vector<8x2x32xf32>,
    return
  }
  func.func @transform_0(%arg0: i32) -> i32 {
    %c0_i32 = arith.constant 0 : i32
    %c0_i32_0 = arith.constant 0 : i32
    return %c0_i32 : i32
  }
  func.func @transform_1(%arg0: i32) -> (i32, i32, i32) {
    %c0_i32 = arith.constant 0 : i32
    %c0_i32_0 = arith.constant 0 : i32
    %c0_i32_1 = arith.constant 0 : i32
    return %arg0, %c0_i32, %c0_i32_0 : i32, i32, i32
  }
  func.func @transform_2(%arg0: i32) -> (i32, i32, i32) {
    %c0_i32 = arith.constant 0 : i32
    %c0_i32_0 = arith.constant 0 : i32
    %c0_i32_1 = arith.constant 0 : i32
    return %arg0, %c0_i32, %c0_i32_0 : i32, i32, i32
  }
  func.func @transform_3(%arg0: i32) -> (i32, i32, i32) {
    %c0_i32 = arith.constant 0 : i32
    %c0_i32_0 = arith.constant 0 : i32
    %c0_i32_1 = arith.constant 0 : i32
    return %arg0, %c0_i32, %c0_i32_0 : i32, i32, i32
  }
}

</mosaic_0001>

<bundles_post_ra>
// kernel: tpu_custom_call.1
= control target key start
LH: loop header
LB: loop body
LE: loop exit
PB: predicated region body
PF: predicated region fallthrough
CT: control target
= control target key end

     0   :  { %9 = vsyncpa [#allocation4], 0  ;;  %s277_s0 = inlined_call_operand.<no memory space> [shape: s32[1], index: 0, kind: input, shape index: {}]   ;;  %s278_s1 = inlined_call_operand.hbm [shape: f32[8,2,32], index: 1, kind: input, shape index: {}]   ;;  %s279_s2 = inlined_call_operand.hbm [shape: f32[8,1,32], index: 2, kind: input, shape index: {}]   ;;  %s280_s3 = inlined_call_operand.hbm [shape: f32[8,2,32], index: 3, kind: output, shape index: {}]  }
   0x1   :  { %10 = vsyncpa [#allocation7], 0 }
   0x2   :  { %11 = vsyncpa [#allocation5], 0  ;;  %s224_s12 = smov [#allocation3]  }
   0x3   :  { %s19_s13 = sshll.u32 %s224_s12, 4  ;;  %s20_s13 = int_to_ptr.vmem [resolvable:$true] %s19_s13 }
   0x4   :  { %s166_s14 = scalar_lea.vmem %s20_s13, 256  ;;  %p171_p1 = scmp.lt.s32.totalorder %s20_s13, %s20_s13 }
   0x5   :  { %p167_p0 = scmp.ne.s32.totalorder %s20_s13, %s166_s14  ;;  %p172_p2 = scmp.lt.s32.totalorder %s166_s14, %s166_s14 }
   0x7   :  { %p173_p3 = por %p172_p2, %p171_p1 }
   0x9   :  { %p174_p4 = pnand %p173_p3, %p167_p0 }
   0xb   :  { %177 = shalt.err (!%p174_p4)
}
   0xc   :  { %s225_s0 = smov 32   ;;  %s226_s15 = smov 2  }
   0xd   :  { %25 = dma.hbm_to_vmem [thread:$0]  %s278_s1, 256, %s20_s13, [#allocation4], %s225_s0, %s225_s0, %s226_s15  }
   0xe   :  { %s227_s18 = smov [#allocation6]  }
   0xf   :  { %s31_s19 = sshll.u32 %s227_s18, 4  ;;  %s32_s19 = int_to_ptr.vmem [resolvable:$true] %s31_s19 }
  0x10   :  { %s186_s20 = scalar_lea.vmem %s32_s19, 128  ;;  %p191_p6 = scmp.lt.s32.totalorder %s32_s19, %s32_s19 }
  0x11   :  { %p187_p5 = scmp.ne.s32.totalorder %s32_s19, %s186_s20  ;;  %p192_p7 = scmp.lt.s32.totalorder %s186_s20, %s186_s20 }
  0x13   :  { %p193_p8 = por %p192_p7, %p191_p6 }
  0x15   :  { %p194_p9 = pnand %p193_p8, %p187_p5 }
  0x17   :  { %197 = shalt.err (!%p194_p9)
}
  0x18   :  { %s228_s21 = smov 16   ;;  %s229_s22 = smov 1  }
  0x19   :  { %37 = dma.hbm_to_vmem [thread:$0]  %s279_s2, 128, %s32_s19, [#allocation7], %s228_s21, %s228_s21, %s229_s22  }
  0x1a   :  { %218 = dma.done.wait [#allocation4], 256  }
  0x1b   :  { %219 = vsyncadd [#allocation4], 4294967040 }
  0x1c   :  { %220 = dma.done.wait [#allocation7], 128  }
  0x1d   :  { %221 = vsyncadd [#allocation7], 4294967168  ;;  %vm116_vm0 = vcmask 254976   ;;  %s230_s1 = smov [#allocation8]   ;;  %v44_v0 = vld [vmem:[#allocation3] sm:$0x3] }
  0x1e   :  { %s260_s25 = sshll.u32 %s230_s1, 4  ;;  %v143_v1 = vld [vmem:[#allocation6] ss:$0 sm:$0xff]  ;;  %v45_v2 = vld [vmem:[#allocation3 + $0x2] sm:$0x3]  ;;  %s131_s25 = int_to_ptr.vmem [resolvable:$true] %s260_s25 }
  0x1f   :  { %v108_v3 = vadd.f32 %v143_v1, %v44_v0  ;;  %v144_v4 = vld [vmem:[#allocation6 + $0x1] ss:$0 sm:$0xff]  ;;  %v46_v5 = vld [vmem:[#allocation3 + $0x4] sm:$0x3]  ;;  %v145_v6 = vld [vmem:[#allocation6 + $0x2] ss:$0 sm:$0xff]  ;;  %p203_p11 = scmp.lt.s32.totalorder %s131_s25, %s131_s25 }
  0x20   :  { %v109_v7 = vadd.f32 %v144_v4, %v45_v2  ;;  %v110_v8 = vadd.f32 %v145_v6, %v46_v5  ;;  %v47_v9 = vld [vmem:[#allocation3 + $0x6] sm:$0x3]  ;;  %v146_v10 = vld [vmem:[#allocation6 + $0x3] ss:$0 sm:$0xff]  ;;  %v48_v11 = vld [vmem:[#allocation3 + $0x8] sm:$0x3] }
  0x21   :  { %117 = vst.msk [vmem:[#allocation8] sm:$0x3] %vm116_vm0, %v108_v3  ;;  %v111_v12 = vadd.f32 %v146_v10, %v47_v9  ;;  %v147_v13 = vld [vmem:[#allocation6 + $0x4] ss:$0 sm:$0xff]  ;;  %v49_v14 = vld [vmem:[#allocation3 + $0xa] sm:$0x3] }
  0x22   :  { %v148_v15 = vld [vmem:[#allocation6 + $0x5] ss:$0 sm:$0xff]  ;;  %118 = vst.msk [vmem:[#allocation8 + $0x2] sm:$0x3] %vm116_vm0, %v109_v7  ;;  %119 = vst.msk [vmem:[#allocation8 + $0x4] sm:$0x3] %vm116_vm0, %v110_v8  ;;  %v112_v16 = vadd.f32 %v147_v13, %v48_v11 }
  0x23   :  { %v113_v17 = vadd.f32 %v148_v15, %v49_v14  ;;  %v50_v18 = vld [vmem:[#allocation3 + $0xc] sm:$0x3]  ;;  %v149_v19 = vld [vmem:[#allocation6 + $0x6] ss:$0 sm:$0xff]  ;;  %v51_v20 = vld [vmem:[#allocation3 + $0xe] sm:$0x3] }
  0x24   :  { %120 = vst.msk [vmem:[#allocation8 + $0x6] sm:$0x3] %vm116_vm0, %v111_v12  ;;  %v114_v21 = vadd.f32 %v149_v19, %v50_v18  ;;  %v150_v22 = vld [vmem:[#allocation6 + $0x7] ss:$0 sm:$0xff]  ;;  %121 = vst.msk [vmem:[#allocation8 + $0x8] sm:$0x3] %vm116_vm0, %v112_v16 }
  0x25   :  { %122 = vst.msk [vmem:[#allocation8 + $0xa] sm:$0x3] %vm116_vm0, %v113_v17  ;;  %v115_v23 = vadd.f32 %v150_v22, %v51_v20  ;;  %s198_s2 = scalar_lea.vmem %s131_s25, 256 }
  0x26   :  { %123 = vst.msk [vmem:[#allocation8 + $0xc] sm:$0x3] %vm116_vm0, %v114_v21  ;;  %p199_p10 = scmp.ne.s32.totalorder %s131_s25, %s198_s2  ;;  %p204_p12 = scmp.lt.s32.totalorder %s198_s2, %s198_s2 }
  0x27   :  { %124 = vst.msk [vmem:[#allocation8 + $0xe] sm:$0x3] %vm116_vm0, %v115_v23 }
  0x28   :  { %p205_p13 = por %p204_p12, %p203_p11 }
  0x2a   :  { %p206_p0 = pnand %p205_p13, %p199_p10 }
  0x2c   :  { %209 = shalt.err (!%p206_p0)
}
  0x2d   :  { %136 = dma.vmem_to_hbm [thread:$0]  %s131_s25, 256, %s280_s3, [#allocation5], %s225_s0, %s225_s0, %s226_s15  }
  0x2e   :  { %222 = dma.done.wait [#allocation5], 256  }
  0x2f   :  { %223 = vsyncadd [#allocation5], 4294967040 }
  0x30   :  { %140 = vsyncpa [#allocation4], 1 }
  0x31   :  { %141 = vsyncpa [#allocation7], 1 }
  0x32   :  { %142 = vsyncpa [#allocation5], 1 }

</bundles_post_ra>
